<compile_context>
chip_gen: v7x
topology: tpu7x:2x2x1
jax: 0.10.0
libtpu: 0.0.40
codegen_flags: <defaults>
</compile_context>

<pallas_src>
import functools

import jax
import jax.numpy as jnp
from jax.experimental import pallas as pl
from jax.experimental.pallas import tpu as pltpu


_NEG_INF = -1e30  # f32 bias for padded softmax columns -> exp() == 0


def _round_up(x, m):
    return ((x + m - 1) // m) * m


def _pad_axis(a, axis, new_size, value=0.0):
    pad = new_size - a.shape[axis]
    if pad <= 0:
        return a
    widths = [(0, 0)] * a.ndim
    widths[axis] = (0, pad)
    return jnp.pad(a, widths, constant_values=value)


def _tensorcores_per_device():
    """Best-effort TensorCore count per chip: v7x has 2 (megacore), v5e/v6e 1."""
    try:
        kind = jax.devices()[0].device_kind.lower()
    except Exception:
        return 1
    return 2 if "v7" in kind else 1


# ----------------------------------------------------------------------------
# Kernel
# ----------------------------------------------------------------------------
def _tmapper_kernel(x_ref,
                    w1_ref, b1_ref,
                    w2_ref, b2_ref,
                    w3_ref, b3_ref,
                    w4_ref, b4_ref,
                    o_ref):
    """Fused 4-layer MLP + row softmax over one batch tile (all on-chip).

    Weights arrive pre-transposed to [in, out] (optionally bf16); biases are
    f32.  Matmuls accumulate in f32 on the MXU; bias/ReLU/softmax are f32.
    Softmax is strictly row-wise, so out-of-range rows of a partial last
    batch tile never contaminate valid rows.
    """
    wdt = w1_ref.dtype
    x = x_ref[...].astype(wdt)

    h = jnp.dot(x, w1_ref[...], preferred_element_type=jnp.float32) + b1_ref[...]
    h = jnp.maximum(h, 0.0)

    h = jnp.dot(h.astype(wdt), w2_ref[...],
                preferred_element_type=jnp.float32) + b2_ref[...]
    h = jnp.maximum(h, 0.0)

    h = jnp.dot(h.astype(wdt), w3_ref[...],
                preferred_element_type=jnp.float32) + b3_ref[...]
    h = jnp.maximum(h, 0.0)

    logits = jnp.dot(h.astype(wdt), w4_ref[...],
                     preferred_element_type=jnp.float32) + b4_ref[...]

    # softmax over dim=1 (feature / lane axis).  Padded logit columns carry a
    # -1e30 f32 bias, so they contribute exp() == 0 to the denominator.
    m = jnp.max(logits, axis=1, keepdims=True)
    e = jnp.exp(logits - m)
    denom = jnp.sum(e, axis=1, keepdims=True)
    # Exact division: downstream OT code may assume exactly-normalized rows.
    o_ref[...] = (e / denom).astype(o_ref.dtype)


# ----------------------------------------------------------------------------
# One-time parameter preparation (hoisted out of the per-call forward)
# ----------------------------------------------------------------------------
def prepare_params(params, use_bf16=True):
    """Pad hidden/output dims to 128 lanes, cast weights, do it ONCE at init.

    Returns a dict of device arrays ready for tmapper_forward.  Padded output
    columns get a -1e30 f32 bias so softmax ignores them (bias stays f32 —
    never cast it to bf16).
    """
    w1, b1 = params["w1"], params["b1"]
    w2, b2 = params["w2"], params["b2"]
    w3, b3 = params["w3"], params["b3"]
    w4, b4 = params["w4"], params["b4"]
    H = w1.shape[1]
    Fout = w4.shape[1]

    Hp = _round_up(H, 128)
    Foutp = _round_up(Fout, 128)

    wdt = jnp.bfloat16 if use_bf16 else jnp.float32
    prepped = {
        "w1": _pad_axis(w1, 1, Hp).astype(wdt),
        "b1": _pad_axis(b1, 1, Hp).astype(jnp.float32),
        "w2": _pad_axis(_pad_axis(w2, 0, Hp), 1, Hp).astype(wdt),
        "b2": _pad_axis(b2, 1, Hp).astype(jnp.float32),
        "w3": _pad_axis(_pad_axis(w3, 0, Hp), 1, Hp).astype(wdt),
        "b3": _pad_axis(b3, 1, Hp).astype(jnp.float32),
        "w4": _pad_axis(_pad_axis(w4, 0, Hp), 1, Foutp).astype(wdt),
        "b4": _pad_axis(b4, 1, Foutp, value=_NEG_INF).astype(jnp.float32),
    }
    return jax.device_put(prepped)


# ----------------------------------------------------------------------------
# Forward
# ----------------------------------------------------------------------------
@functools.partial(jax.jit,
                   static_argnames=("features_out", "batch_tile", "num_cores"))
def tmapper_forward(x_cat, prepped, features_out, batch_tile=1024, num_cores=1):
    """x_cat: [B, features_in + 1] float32; prepped: output of prepare_params."""
    B, Fin1 = x_cat.shape
    Hp = prepped["w1"].shape[1]
    Foutp = prepped["w4"].shape[1]

    # ---- batch tiling -------------------------------------------------------
    # Multiples of 16 keep packed bf16 activation tiles full.  Single-TC chips
    # (v5e/v6e) get one big tile for small B; on v7x we split into a balanced,
    # even number of tiles so both TensorCores get equal work.
    tb = min(batch_tile, B)
    if tb != B:
        tb = max(16, (tb // 16) * 16)
    if num_cores > 1 and B >= 2 * 16:
        n_steps = max(pl.cdiv(B, tb), num_cores)
        n_steps = _round_up(n_steps, num_cores)
        tb = max(16, _round_up(pl.cdiv(B, n_steps), 16))
        tb = min(tb, B)
    grid = (pl.cdiv(B, tb),)

    # Weights/biases are small: replicate the full (padded) tensor each step.
    rep2 = lambda i: (0, 0)

    out = pl.pallas_call(
        _tmapper_kernel,
        out_shape=jax.ShapeDtypeStruct((B, Foutp), jnp.float32),
        grid_spec=pltpu.PrefetchScalarGridSpec(
            num_scalar_prefetch=0,
            grid=grid,
            in_specs=[
                pl.BlockSpec((tb, Fin1), lambda i: (i, 0)),
                pl.BlockSpec((Fin1, Hp), rep2),   pl.BlockSpec((1, Hp), rep2),
                pl.BlockSpec((Hp, Hp), rep2),     pl.BlockSpec((1, Hp), rep2),
                pl.BlockSpec((Hp, Hp), rep2),     pl.BlockSpec((1, Hp), rep2),
                pl.BlockSpec((Hp, Foutp), rep2),  pl.BlockSpec((1, Foutp), rep2),
            ],
            out_specs=pl.BlockSpec((tb, Foutp), lambda i: (i, 0)),
        ),
        compiler_params=pltpu.CompilerParams(
            dimension_semantics=("parallel",)),
    )(x_cat,
      prepped["w1"], prepped["b1"],
      prepped["w2"], prepped["b2"],
      prepped["w3"], prepped["b3"],
      prepped["w4"], prepped["b4"])

    return out[:, :features_out]


# ----------------------------------------------------------------------------
# Init / reference
# ----------------------------------------------------------------------------
def init_params(key, features_in, features_out, hidden_dims):
    """Deterministic synthetic init.  Weights stored as [in, out] (transposed
    relative to torch.nn.Linear's [out, in]); biases as [1, out]."""
    dims = [(features_in + 1, hidden_dims),
            (hidden_dims, hidden_dims),
            (hidden_dims, hidden_dims),
            (hidden_dims, features_out)]
    params = {}
    for idx, (din, dout) in enumerate(dims, start=1):
        key, kw, kb = jax.random.split(key, 3)
        bound = 1.0 / jnp.sqrt(din)  # torch Linear default: U(-1/sqrt(in), 1/sqrt(in))
        params[f"w{idx}"] = jax.random.uniform(
            kw, (din, dout), jnp.float32, -bound, bound)
        params[f"b{idx}"] = jax.random.uniform(
            kb, (1, dout), jnp.float32, -bound, bound)
    return params


def reference_forward(x_cat, params):
    """Pure-JAX f32 reference for correctness checking."""
    h = x_cat
    for i in range(1, 4):
        h = jnp.maximum(h @ params[f"w{i}"] + params[f"b{i}"], 0.0)
    logits = h @ params["w4"] + params["b4"]
    return jax.nn.softmax(logits, axis=1)


if __name__ == "__main__":
    features_in = 4
    features_out = 4
    hidden_dims = 32
    batch = 64

    key = jax.random.PRNGKey(0)
    kx, kt, kp = jax.random.split(key, 3)

    # TMapper.forward(*input) concatenates its inputs along dim=1;
    # typical call is forward(x, t) with x: [B, features_in], t: [B, 1].
    x = jax.random.normal(kx, (batch, features_in), jnp.float32)
    t = jax.random.uniform(kt, (batch, 1), jnp.float32)
    x_cat = jnp.concatenate([x, t], axis=1)  # glue, matches torch.cat(input, dim=1)

    params = init_params(kp, features_in, features_out, hidden_dims)
    ref = reference_forward(x_cat, params)

    ncores = _tensorcores_per_device()

    # f32 matmul path: tight validation of padding / tiling / softmax logic.
    prepped_f32 = prepare_params(params, use_bf16=False)
    out_f32 = jax.block_until_ready(
        tmapper_forward(x_cat, prepped_f32, features_out, num_cores=ncores))
    assert out_f32.shape == (batch, features_out)
    assert jnp.allclose(out_f32, ref, atol=1e-3, rtol=1e-3), "f32 path mismatch"
    assert jnp.allclose(jnp.sum(out_f32, axis=1), 1.0, atol=1e-4), \
        "f32 softmax rows must sum to 1"

    # Default (bf16 matmuls, f32 accumulation): relaxed value tolerance, but
    # rows still sum to 1 to f32 precision (exact normalization).
    prepped = prepare_params(params, use_bf16=True)
    out = jax.block_until_ready(
        tmapper_forward(x_cat, prepped, features_out, num_cores=ncores))
    assert out.shape == (batch, features_out)
    assert jnp.allclose(out, ref, atol=2e-2, rtol=2e-2), "mismatch vs reference"
    assert jnp.allclose(jnp.sum(out, axis=1), 1.0, atol=2e-3), \
        "softmax rows must sum to 1"

    print("KERNEL_OK")
</pallas_src>

<mosaic_0001>
module attributes {stable_mosaic.version = 11 : i64} {
  func.func @_tmapper_kernel(%arg0: i32, %arg1: memref<64x5xf32, #tpu.memory_space<vmem>>, %arg2: memref<5x128xf32, #tpu.memory_space<vmem>>, %arg3: memref<1x128xf32, #tpu.memory_space<vmem>>, %arg4: memref<128x128xf32, #tpu.memory_space<vmem>>, %arg5: memref<1x128xf32, #tpu.memory_space<vmem>>, %arg6: memref<128x128xf32, #tpu.memory_space<vmem>>, %arg7: memref<1x128xf32, #tpu.memory_space<vmem>>, %arg8: memref<128x128xf32, #tpu.memory_space<vmem>>, %arg9: memref<1x128xf32, #tpu.memory_space<vmem>>, %arg10: memref<64x128xf32, #tpu.memory_space<vmem>>) attributes {dimension_semantics = [#tpu.dimension_semantics<parallel>], iteration_bounds = array<i64: 1>, scalar_prefetch = 0 : i64, scratch_operands = 0 : i64, tpu.core_type = #tpu.core_type<tc>, window_params = [{transform_indices = @transform_0, window_bounds = array<i64: 64, 5>}, {pipeline_mode = #tpu.pipeline_mode<synchronous>, transform_indices = @transform_1, window_bounds = array<i64: 5, 128>}, {pipeline_mode = #tpu.pipeline_mode<synchronous>, transform_indices = @transform_2, window_bounds = array<i64: 1, 128>}, {pipeline_mode = #tpu.pipeline_mode<synchronous>, transform_indices = @transform_3, window_bounds = array<i64: 128, 128>}, {pipeline_mode = #tpu.pipeline_mode<synchronous>, transform_indices = @transform_4, window_bounds = array<i64: 1, 128>}, {pipeline_mode = #tpu.pipeline_mode<synchronous>, transform_indices = @transform_5, window_bounds = array<i64: 128, 128>}, {pipeline_mode = #tpu.pipeline_mode<synchronous>, transform_indices = @transform_6, window_bounds = array<i64: 1, 128>}, {pipeline_mode = #tpu.pipeline_mode<synchronous>, transform_indices = @transform_7, window_bounds = array<i64: 128, 128>}, {pipeline_mode = #tpu.pipeline_mode<synchronous>, transform_indices = @transform_8, window_bounds = array<i64: 1, 128>}, {transform_indices = @transform_9, window_bounds = array<i64: 64, 128>}]} {
    %c0 = arith.constant 0 : index
    %c0_0 = arith.constant 0 : index
    %0 = vector.load %arg1[%c0, %c0_0] : memref<64x5xf32, #tpu.memory_space<vmem>>, vector<64x5xf32>
    %c0_1 = arith.constant 0 : index
    %c0_2 = arith.constant 0 : index
    %1 = vector.load %arg2[%c0_1, %c0_2] : memref<5x128xf32, #tpu.memory_space<vmem>>, vector<5x128xf32>
    %cst = arith.constant dense<0.000000e+00> : vector<64x128xf32>
    %2 = tpu.matmul %0, %1, %cst {dimension_numbers = #tpu.dot_dimension_numbers<[1], [0], [0], [1], [0, 0, 1, 1], [], []>} : vector<64x5xf32>, vector<5x128xf32>, vector<64x128xf32> -> vector<64x128xf32>
    %c0_3 = arith.constant 0 : index
    %c0_4 = arith.constant 0 : index
    %3 = vector.load %arg3[%c0_3, %c0_4] : memref<1x128xf32, #tpu.memory_space<vmem>>, vector<1x128xf32>
    %4 = vector.broadcast %3 : vector<1x128xf32> to vector<64x128xf32>
    %5 = arith.addf %2, %4 : vector<64x128xf32>
    %cst_5 = arith.constant 0.000000e+00 : f32
    %6 = vector.broadcast %cst_5 : f32 to vector<64x128xf32>
    %7 = arith.maximumf %5, %6 : vector<64x128xf32>
    %c0_6 = arith.constant 0 : index
    %c0_7 = arith.constant 0 : index
    %8 = vector.load %arg4[%c0_6, %c0_7] : memref<128x128xf32, #tpu.memory_space<vmem>>, vector<128x128xf32>
    %cst_8 = arith.constant dense<0.000000e+00> : vector<64x128xf32>
    %9 = tpu.matmul %7, %8, %cst_8 {dimension_numbers = #tpu.dot_dimension_numbers<[1], [0], [0], [1], [0, 0, 1, 1], [], []>} : vector<64x128xf32>, vector<128x128xf32>, vector<64x128xf32> -> vector<64x128xf32>
    %c0_9 = arith.constant 0 : index
    %c0_10 = arith.constant 0 : index
    %10 = vector.load %arg5[%c0_9, %c0_10] : memref<1x128xf32, #tpu.memory_space<vmem>>, vector<1x128xf32>
    %11 = vector.broadcast %10 : vector<1x128xf32> to vector<64x128xf32>
    %12 = arith.addf %9, %11 : vector<64x128xf32>
    %cst_11 = arith.constant 0.000000e+00 : f32
    %13 = vector.broadcast %cst_11 : f32 to vector<64x128xf32>
    %14 = arith.maximumf %12, %13 : vector<64x128xf32>
    %c0_12 = arith.constant 0 : index
    %c0_13 = arith.constant 0 : index
    %15 = vector.load %arg6[%c0_12, %c0_13] : memref<128x128xf32, #tpu.memory_space<vmem>>, vector<128x128xf32>
    %cst_14 = arith.constant dense<0.000000e+00> : vector<64x128xf32>
    %16 = tpu.matmul %14, %15, %cst_14 {dimension_numbers = #tpu.dot_dimension_numbers<[1], [0], [0], [1], [0, 0, 1, 1], [], []>} : vector<64x128xf32>, vector<128x128xf32>, vector<64x128xf32> -> vector<64x128xf32>
    %c0_15 = arith.constant 0 : index
    %c0_16 = arith.constant 0 : index
    %17 = vector.load %arg7[%c0_15, %c0_16] : memref<1x128xf32, #tpu.memory_space<vmem>>, vector<1x128xf32>
    %18 = vector.broadcast %17 : vector<1x128xf32> to vector<64x128xf32>
    %19 = arith.addf %16, %18 : vector<64x128xf32>
    %cst_17 = arith.constant 0.000000e+00 : f32
    %20 = vector.broadcast %cst_17 : f32 to vector<64x128xf32>
    %21 = arith.maximumf %19, %20 : vector<64x128xf32>
    %c0_18 = arith.constant 0 : index
    %c0_19 = arith.constant 0 : index
    %22 = vector.load %arg8[%c0_18, %c0_19] : memref<128x128xf32, #tpu.memory_space<vmem>>, vector<128x128xf32>
    %cst_20 = arith.constant dense<0.000000e+00> : vector<64x128xf32>
    %23 = tpu.matmul %21, %22, %cst_20 {dimension_numbers = #tpu.dot_dimension_numbers<[1], [0], [0], [1], [0, 0, 1, 1], [], []>} : vector<64x128xf32>, vector<128x128xf32>, vector<64x128xf32> -> vector<64x128xf32>
    %c0_21 = arith.constant 0 : index
    %c0_22 = arith.constant 0 : index
    %24 = vector.load %arg9[%c0_21, %c0_22] : memref<1x128xf32, #tpu.memory_space<vmem>>, vector<1x128xf32>
    %25 = vector.broadcast %24 : vector<1x128xf32> to vector<64x128xf32>
    %26 = arith.addf %23, %25 : vector<64x128xf32>
    %cst_23 = arith.constant dense<0xFF800000> : vector<64xf32>
    %27 = vector.multi_reduction <maximumf>, %26, %cst_23 [1] : vector<64x128xf32> to vector<64xf32>
    %28 = vector.shape_cast %27 : vector<64xf32> to vector<64x1xf32>
    %29 = vector.broadcast %28 : vector<64x1xf32> to vector<64x128xf32>
    %30 = arith.subf %26, %29 : vector<64x128xf32>
    %31 = math.exp %30 : vector<64x128xf32>
    %cst_24 = arith.constant dense<0.000000e+00> : vector<64xf32>
    %32 = vector.multi_reduction <add>, %31, %cst_24 [1] : vector<64x128xf32> to vector<64xf32>
    %33 = vector.shape_cast %32 : vector<64xf32> to vector<64x1xf32>
    %34 = vector.broadcast %33 : vector<64x1xf32> to vector<64x128xf32>
    %35 = arith.divf %31, %34 : vector<64x128xf32>
    %c0_25 = arith.constant 0 : index
    %c0_26 = arith.constant 0 : index
    %36 = vector.load %arg10[%c0_25, %c0_26] : memref<64x128xf32, #tpu.memory_space<vmem>>, vector<64x128xf32>
    tpu.vector_store %arg10[%c0_25, %c0_26], %35 {strides = array<i32>} : memref<64x128xf32, #tpu.memory_space<vmem>>, vector<64x128xf32>,
    return
  }
  func.func @transform_0(%arg0: i32) -> (i32, i32) {
    %c0_i32 = arith.constant 0 : i32
    %c0_i32_0 = arith.constant 0 : i32
    return %arg0, %c0_i32 : i32, i32
  }
  func.func @transform_1(%arg0: i32) -> (i32, i32) {
    %c0_i32 = arith.constant 0 : i32
    %c0_i32_0 = arith.constant 0 : i32
    %c0_i32_1 = arith.constant 0 : i32
    return %c0_i32, %c0_i32_0 : i32, i32
  }
  func.func @transform_2(%arg0: i32) -> (i32, i32) {
    %c0_i32 = arith.constant 0 : i32
    %c0_i32_0 = arith.constant 0 : i32
    %c0_i32_1 = arith.constant 0 : i32
    return %c0_i32, %c0_i32_0 : i32, i32
  }
  func.func @transform_3(%arg0: i32) -> (i32, i32) {
    %c0_i32 = arith.constant 0 : i32
    %c0_i32_0 = arith.constant 0 : i32
    %c0_i32_1 = arith.constant 0 : i32
    return %c0_i32, %c0_i32_0 : i32, i32
  }
  func.func @transform_4(%arg0: i32) -> (i32, i32) {
    %c0_i32 = arith.constant 0 : i32
    %c0_i32_0 = arith.constant 0 : i32
    %c0_i32_1 = arith.constant 0 : i32
    return %c0_i32, %c0_i32_0 : i32, i32
  }
  func.func @transform_5(%arg0: i32) -> (i32, i32) {
    %c0_i32 = arith.constant 0 : i32
    %c0_i32_0 = arith.constant 0 : i32
    %c0_i32_1 = arith.constant 0 : i32
    return %c0_i32, %c0_i32_0 : i32, i32
  }
  func.func @transform_6(%arg0: i32) -> (i32, i32) {
    %c0_i32 = arith.constant 0 : i32
    %c0_i32_0 = arith.constant 0 : i32
    %c0_i32_1 = arith.constant 0 : i32
    return %c0_i32, %c0_i32_0 : i32, i32
  }
  func.func @transform_7(%arg0: i32) -> (i32, i32) {
    %c0_i32 = arith.constant 0 : i32
    %c0_i32_0 = arith.constant 0 : i32
    %c0_i32_1 = arith.constant 0 : i32
    return %c0_i32, %c0_i32_0 : i32, i32
  }
  func.func @transform_8(%arg0: i32) -> (i32, i32) {
    %c0_i32 = arith.constant 0 : i32
    %c0_i32_0 = arith.constant 0 : i32
    %c0_i32_1 = arith.constant 0 : i32
    return %c0_i32, %c0_i32_0 : i32, i32
  }
  func.func @transform_9(%arg0: i32) -> (i32, i32) {
    %c0_i32 = arith.constant 0 : i32
    %c0_i32_0 = arith.constant 0 : i32
    return %arg0, %c0_i32 : i32, i32
  }
}

</mosaic_0001>

<bundles_post_ra>
// kernel: tmapper_forward.1
= control target key start
LH: loop header
LB: loop body
LE: loop exit
PB: predicated region body
PF: predicated region fallthrough
CT: control target
= control target key end

     0   :  { %14 = vsyncpa [#allocation3], 0  ;;  %s1354_s0 = inlined_call_operand.vmem [shape: f32[64,5], index: 0, kind: input, shape index: {}]   ;;  %s1355_s1 = inlined_call_operand.vmem [shape: f32[5,128], index: 1, kind: input, shape index: {}]   ;;  %s1356_s2 = inlined_call_operand.vmem [shape: f32[1,128], index: 2, kind: input, shape index: {}]   ;;  %s1357_s3 = inlined_call_operand.hbm [shape: f32[128,128], index: 3, kind: input, shape index: {}]   ;;  %s1358_s4 = inlined_call_operand.vmem [shape: f32[1,128], index: 4, kind: input, shape index: {}]   ;;  %s1359_s5 = inlined_call_operand.hbm [shape: f32[128,128], index: 5, kind: input, shape index: {}]   ;;  %s1360_s6 = inlined_call_operand.vmem [shape: f32[1,128], index: 6, kind: input, shape index: {}]   ;;  %s1361_s7 = inlined_call_operand.hbm [shape: f32[128,128], index: 7, kind: input, shape index: {}]   ;;  %s1362_s8 = inlined_call_operand.vmem [shape: f32[1,128], index: 8, kind: input, shape index: {}]   ;;  %s1363_s9 = inlined_call_operand.vmem [shape: f32[64,128], index: 9, kind: output, shape index: {}]  }
   0x1   :  { %15 = vsyncpa [#allocation5], 0  ;;  %s1176_s30 = smov [#allocation4]   ;;  %s1177_s11 = smov [#allocation2]  }
   0x2   :  { %s41_s10 = sshll.u32 %s1176_s30, 4  ;;  %s27_s12 = sshll.u32 %s1177_s11, 4  ;;  %s42_s10 = int_to_ptr.vmem [resolvable:$true] %s41_s10  ;;  %s1231_s12 = int_to_ptr.vmem [resolvable:$true] %s27_s12 }
   0x3   :  { %s1106_s15 = scalar_lea.hbm %s1359_s5, 2048 }
   0x4   :  { %p1107_p0 = scmp.ne.s32.totalorder %s1359_s5, %s1106_s15  ;;  %p1110_p1 = scmp.lt.u32.totalorder %s1106_s15, %s1359_s5 }
   0x6   :  { %p1112_p2 = pnand %p1110_p1, %p1107_p0 }
   0x8   :  { %1115 = shalt.err (!%p1112_p2)
}
   0x9   :  { %s1116_s20 = scalar_lea.vmem %s42_s10, 2048  ;;  %p1121_p4 = scmp.lt.s32.totalorder %s42_s10, %s42_s10 }
   0xa   :  { %p1117_p3 = scmp.ne.s32.totalorder %s42_s10, %s1116_s20  ;;  %p1122_p5 = scmp.lt.s32.totalorder %s1116_s20, %s1116_s20 }
   0xc   :  { %p1123_p6 = por %p1122_p5, %p1121_p4 }
   0xe   :  { %p1124_p7 = pnand %p1123_p6, %p1117_p3 }
  0x10   :  { %1127 = shalt.err (!%p1124_p7)
}
  0x11   :  { %s1178_s21 = smov 128   ;;  %s1179_s22 = smov 8  }
  0x12   :  { %47 = dma.hbm_to_vmem [thread:$0]  %s1359_s5, 2048, %s42_s10, [#allocation5], %s1178_s21, %s1178_s21, %s1179_s22  }
  0x13   :  { %s1128_s27 = scalar_lea.hbm %s1357_s3, 2048 }
  0x14   :  { %p1129_p8 = scmp.ne.s32.totalorder %s1357_s3, %s1128_s27  ;;  %p1132_p9 = scmp.lt.u32.totalorder %s1128_s27, %s1357_s3 }
  0x16   :  { %p1134_p10 = pnand %p1132_p9, %p1129_p8 }
  0x18   :  { %1137 = shalt.err (!%p1134_p10)
}
  0x19   :  { %s1138_s13 = scalar_lea.vmem %s1231_s12, 2048  ;;  %p1143_p12 = scmp.lt.s32.totalorder %s1231_s12, %s1231_s12 }
  0x1a   :  { %p1139_p11 = scmp.ne.s32.totalorder %s1231_s12, %s1138_s13  ;;  %p1144_p13 = scmp.lt.s32.totalorder %s1138_s13, %s1138_s13 }
  0x1c   :  { %p1145_p0 = por %p1144_p13, %p1143_p12 }
  0x1e   :  { %p1146_p1 = pnand %p1145_p0, %p1139_p11 }
  0x20   :  { %1149 = shalt.err (!%p1146_p1)
}
  0x21   :  { %33 = dma.hbm_to_vmem [thread:$0]  %s1357_s3, 2048, %s1231_s12, [#allocation3], %s1178_s21, %s1178_s21, %s1179_s22  }
  0x22   :  { %s1180_s14 = smov [#allocation6]   ;;  %s1150_s18 = scalar_lea.hbm %s1361_s7, 2048 }
  0x23   :  { %s55_s15 = sshll.u32 %s1180_s14, 4  ;;  %p1151_p2 = scmp.ne.s32.totalorder %s1361_s7, %s1150_s18  ;;  %s56_s15 = int_to_ptr.vmem [resolvable:$true] %s55_s15 }
  0x24   :  { %p1154_p3 = scmp.lt.u32.totalorder %s1150_s18, %s1361_s7 }
  0x26   :  { %p1156_p4 = pnand %p1154_p3, %p1151_p2 }
  0x28   :  { %1159 = shalt.err (!%p1156_p4)
}
  0x29   :  { %s1160_s25 = scalar_lea.vmem %s56_s15, 2048  ;;  %p1165_p6 = scmp.lt.s32.totalorder %s56_s15, %s56_s15 }
  0x2a   :  { %p1161_p5 = scmp.ne.s32.totalorder %s56_s15, %s1160_s25  ;;  %p1166_p7 = scmp.lt.s32.totalorder %s1160_s25, %s1160_s25 }
  0x2c   :  { %p1167_p8 = por %p1166_p7, %p1165_p6 }
  0x2e   :  { %p1168_p9 = pnand %p1167_p8, %p1161_p5 }
  0x30   :  { %1171 = shalt.err (!%p1168_p9)
}
  0x31   :  { %61 = dma.hbm_to_vmem [thread:$0]  %s1361_s7, 2048, %s56_s15, [#allocation5], %s1178_s21, %s1178_s21, %s1179_s22  }
  0x32   :  { %1172 = dma.done.wait [#allocation3], 2048  }
  0x33   :  { %1173 = vsyncadd [#allocation3], 4294965248 }
  0x34   :  { %1174 = dma.done.wait [#allocation5], 4096  }
  0x35   :  { %1175 = vsyncadd [#allocation5], 4294963200  ;;  %vm114_vm0 = vcmask 1044480   ;;  %vm89_vm1 = vcmask 39936   ;;  %v81_v0 = vld [vmem:[%s1355_s1] sm:$0x1f] }
  0x36   :  { %v73_v1 = vld [vmem:[%s1354_s0] sm:$0xff]  ;;  %v74_v2 = vld [vmem:[%s1354_s0 + $0x8] sm:$0xff]  ;;  %811 = vmatprep.subr.msk.mxu0 %vm114_vm0, %v81_v0  ;;  %v75_v3 = vld [vmem:[%s1354_s0 + $0x10] sm:$0xff] }
  0x37   :  { %813 = vmatprep.mubr.msk.f32.mxu0 %vm89_vm1, %v73_v1  ;;  %812 = vmatpush3.msk.msra.mxu0 %vm114_vm0, %v81_v0  ;;  %v231_v4 = vld [vmem:[#allocation2] sm:$0xff]  ;;  %v232_v5 = vld [vmem:[#allocation2 + $0x8] sm:$0xff]  ;;  %v233_v6 = vld [vmem:[#allocation2 + $0x10] sm:$0xff] }
  0x38   :  { %814 = vmatmul.mubr.msk.f32.vlgmr.msra.gmra.mrb[0].mxu0 %vm89_vm1, %v74_v2  ;;  %v76_v7 = vld [vmem:[%s1354_s0 + $0x18] sm:$0xff]  ;;  %v957_v8 = vpack.c.bf16 %v232_v5, %v231_v4  ;;  %v77_v10 = vld [vmem:[%s1354_s0 + $0x20] sm:$0xff]  ;;  %v236_v13 = vld [vmem:[#allocation2 + $0x28] sm:$0xff] }
  0x39   :  { %816 = vmatprep.mubr.msk.f32.mxu0 %vm89_vm1, %v75_v3  ;;  %v234_v9 = vld [vmem:[#allocation2 + $0x18] sm:$0xff]  ;;  %v235_v12 = vld [vmem:[#allocation2 + $0x20] sm:$0xff]  ;;  %v78_v14 = vld [vmem:[%s1354_s0 + $0x28] sm:$0xff] }
  0x3a   :  { %v961_v11 = vpack.c.bf16 %v234_v9, %v233_v6  ;;  %958 = vmatprep.subr.bf16.mxu1 %v957_v8  ;;  %v965_v15 = vpack.c.bf16 %v236_v13, %v235_v12  ;;  %v79_v16 = vld [vmem:[%s1354_s0 + $0x30] sm:$0xff]  ;;  %v238_v18 = vld [vmem:[#allocation2 + $0x38] sm:$0xff]  ;;  %v239_v21 = vld [vmem:[#allocation2 + $0x40] sm:$0xff] }
  0x3b   :  { %960 = vmatpush3.bf16.msra.mxu1 %v957_v8  ;;  %v237_v17 = vld [vmem:[#allocation2 + $0x30] sm:$0xff]  ;;  %v80_v19 = vld [vmem:[%s1354_s0 + $0x38] sm:$0xff]  ;;  %v240_v22 = vld [vmem:[#allocation2 + $0x48] sm:$0xff] }
  0x3c   :  { %817 = vmatmul.mubr.msk.f32.gmra.mrb[2].mxu0 %vm89_vm1, %v76_v7  ;;  %962 = vmatprep.subr.bf16.mxu1 %v961_v11  ;;  %v969_v20 = vpack.c.bf16 %v238_v18, %v237_v17  ;;  %v973_v23 = vpack.c.bf16 %v240_v22, %v239_v21  ;;  %v241_v24 = vld [vmem:[#allocation2 + $0x50] sm:$0xff]  ;;  %v242_v25 = vld [vmem:[#allocation2 + $0x58] sm:$0xff]  ;;  %v243_v27 = vld [vmem:[#allocation2 + $0x60] sm:$0xff] }
  0x3d   :  { %819 = vmatprep.mubr.msk.f32.mxu0 %vm89_vm1, %v77_v10  ;;  %v977_v26 = vpack.c.bf16 %v242_v25, %v241_v24  ;;  %v244_v28 = vld [vmem:[#allocation2 + $0x68] sm:$0xff]  ;;  %v245_v30 = vld [vmem:[#allocation2 + $0x70] sm:$0xff]  ;;  %v246_v31 = vld [vmem:[#allocation2 + $0x78] sm:$0xff] }
  0x3e   :  { %v981_v29 = vpack.c.bf16 %v244_v28, %v243_v27  ;;  %v985_v32 = vpack.c.bf16 %v246_v31, %v245_v30  ;;  %v367_v33 = vld [vmem:[#allocation4] sm:$0xff]  ;;  %v368_v34 = vld [vmem:[#allocation4 + $0x8] sm:$0xff]  ;;  %v369_v35 = vld [vmem:[#allocation4 + $0x10] sm:$0xff] }
  0x3f   :  { %964 = vmatpush3.bf16.msra.mxu1 %v961_v11  ;;  %v989_v36 = vpack.c.bf16 %v368_v34, %v367_v33  ;;  %v370_v37 = vld [vmem:[#allocation4 + $0x18] sm:$0xff]  ;;  %v371_v39 = vld [vmem:[#allocation4 + $0x20] sm:$0xff]  ;;  %v372_v40 = vld [vmem:[#allocation4 + $0x28] sm:$0xff] }
  0x40   :  { %820 = vmatmul.mubr.msk.f32.gmra.mrb[4].mxu0 %vm89_vm1, %v78_v14  ;;  %966 = vmatprep.subr.bf16.mxu1 %v965_v15  ;;  %v993_v38 = vpack.c.bf16 %v370_v37, %v369_v35  ;;  %v997_v41 = vpack.c.bf16 %v372_v40, %v371_v39  ;;  %v373_v42 = vld [vmem:[#allocation4 + $0x30] sm:$0xff]  ;;  %v374_v43 = vld [vmem:[#allocation4 + $0x38] sm:$0xff]  ;;  %v375_v45 = vld [vmem:[#allocation4 + $0x40] sm:$0xff] }
  0x41   :  { %822 = vmatprep.mubr.msk.f32.mxu0 %vm89_vm1, %v79_v16  ;;  %990 = vmatprep.subr.bf16.mxu0 %v989_v36  ;;  %v1001_v44 = vpack.c.bf16 %v374_v43, %v373_v42  ;;  %v376_v46 = vld [vmem:[#allocation4 + $0x48] sm:$0xff]  ;;  %v377_v48 = vld [vmem:[#allocation4 + $0x50] sm:$0xff]  ;;  %v378_v49 = vld [vmem:[#allocation4 + $0x58] sm:$0xff] }
  0x42   :  { %992 = vmatpush3.bf16.msra.mxu0 %v989_v36  ;;  %v1005_v47 = vpack.c.bf16 %v376_v46, %v375_v45  ;;  %v1009_v50 = vpack.c.bf16 %v378_v49, %v377_v48  ;;  %v379_v51 = vld [vmem:[#allocation4 + $0x60] sm:$0xff]  ;;  %v380_v52 = vld [vmem:[#allocation4 + $0x68] sm:$0xff]  ;;  %v382_v16 = vld [vmem:[#allocation4 + $0x78] sm:$0xff] }
  0x43   :  { %968 = vmatpush3.bf16.msra.mxu1 %v965_v15  ;;  %994 = vmatprep.subr.bf16.mxu0 %v993_v38  ;;  %v1013_v53 = vpack.c.bf16 %v380_v52, %v379_v51  ;;  %v717_v54 = vld [vmem:[%s1356_s2] ss:$0 sm:$0xff]  ;;  %v381_v15 = vld [vmem:[#allocation4 + $0x70] sm:$0xff]  ;;  %v506_v22 = vld [vmem:[#allocation6 + $0x18] sm:$0xff] }
  0x44   :  { %823 = vmatmul.mubr.msk.f32.gmra.mrb[6].mxu0 %vm89_vm1, %v80_v19  ;;  %970 = vmatprep.subr.bf16.mxu1 %v969_v20  ;;  %v1017_v17 = vpack.c.bf16 %v382_v16, %v381_v15  ;;  %v503_v18 = vld [vmem:[#allocation6] sm:$0xff]  ;;  %v504_v19 = vld [vmem:[#allocation6 + $0x8] sm:$0xff]  ;;  %v509_v27 = vld [vmem:[#allocation6 + $0x30] sm:$0xff] }
  0x45   :  { %v1021_v21 = vpack.c.bf16 %v504_v19, %v503_v18  ;;  %v507_v24 = vld [vmem:[#allocation6 + $0x20] sm:$0xff]  ;;  %v508_v25 = vld [vmem:[#allocation6 + $0x28] sm:$0xff]  ;;  %v510_v28 = vld [vmem:[#allocation6 + $0x38] sm:$0xff] }
  0x46   :  { %996 = vmatpush3.bf16.msra.mxu0 %v993_v38  ;;  %v511_v30 = vld [vmem:[#allocation6 + $0x40] sm:$0xff]  ;;  %v512_v31 = vld [vmem:[#allocation6 + $0x48] sm:$0xff]  ;;  %v513_v33 = vld [vmem:[#allocation6 + $0x50] sm:$0xff] }
  0x47   :  { %972 = vmatpush3.bf16.msra.mxu1 %v969_v20  ;;  %998 = vmatprep.subr.bf16.mxu0 %v997_v41  ;;  %v505_v20 = vld [vmem:[#allocation6 + $0x10] sm:$0xff]  ;;  %v514_v34 = vld [vmem:[#allocation6 + $0x58] sm:$0xff]  ;;  %v515_v36 = vld [vmem:[#allocation6 + $0x60] sm:$0xff] }
  0x48   :  { %974 = vmatprep.subr.bf16.mxu1 %v973_v23  ;;  %v1041_v35 = vpack.c.bf16 %v514_v34, %v513_v33  ;;  %v516_v37 = vld [vmem:[#allocation6 + $0x68] sm:$0xff]  ;;  %v727_v39 = vld [vmem:[%s1358_s4] ss:$0 sm:$0xff] }
  0x49   :  { %v1045_v38 = vpack.c.bf16 %v516_v37, %v515_v36 }
  0x4a   :  { %1000 = vmatpush3.bf16.msra.mxu0 %v997_v41 }
  0x4b   :  { %976 = vmatpush3.bf16.msra.mxu1 %v973_v23  ;;  %1002 = vmatprep.subr.bf16.mxu0 %v1001_v44  ;;  %v1025_v23 = vpack.c.bf16 %v506_v22, %v505_v20 }
  0x4c   :  { %978 = vmatprep.subr.bf16.mxu1 %v977_v26 }
  0x4e   :  { %1004 = vmatpush3.bf16.msra.mxu0 %v1001_v44 }
  0x4f   :  { %980 = vmatpush3.bf16.msra.mxu1 %v977_v26  ;;  %1006 = vmatprep.subr.bf16.mxu0 %v1005_v47  ;;  %v1029_v26 = vpack.c.bf16 %v508_v25, %v507_v24 }
  0x50   :  { %982 = vmatprep.subr.bf16.mxu1 %v981_v29 }
  0x52   :  { %1008 = vmatpush3.bf16.msra.mxu0 %v1005_v47 }
  0x53   :  { %984 = vmatpush3.bf16.msra.mxu1 %v981_v29  ;;  %1010 = vmatprep.subr.bf16.mxu0 %v1009_v50  ;;  %v1033_v29 = vpack.c.bf16 %v510_v28, %v509_v27  ;;  %v729_v28 = vld [vmem:[%s1362_s8] ss:$0 sm:$0xff] }
  0x54   :  { %986 = vmatprep.subr.bf16.mxu1 %v985_v32 }
  0x56   :  { %1012 = vmatpush3.bf16.msra.mxu0 %v1009_v50 }
  0x57   :  { %988 = vmatpush3.bf16.msra.mxu1 %v985_v32  ;;  %1014 = vmatprep.subr.bf16.mxu0 %v1013_v53  ;;  %v1037_v32 = vpack.c.bf16 %v512_v31, %v511_v30 }
  0x58   :  { %1053 = vmatprep.subr.bf16.mxu1 %v1021_v21 }
  0x5a   :  { %1016 = vmatpush3.bf16.msra.mxu0 %v1013_v53 }
  0x5b   :  { %1018 = vmatprep.subr.bf16.mxu0 %v1017_v17 }
  0x5e   :  { %1020 = vmatpush3.bf16.msra.mxu0 %v1017_v17 }
  0x5f   :  { %1022 = vmatprep.subr.bf16.mxu0 %v1021_v21 }
 0x10b   :  { %v815_v55 = vpop.f32.mrb[0].mxu0 }
 0x10c   :  { %v190_v56 = vadd.f32 %v815_v55, %v717_v54  ;;  %v184_v57 = vpop.f32.mrb[1].mxu0 }
 0x10d   :  { %v185_v58 = vadd.f32 %v717_v54, %v184_v57 }
 0x10e   :  { %v224_v61 = vmax.f32 %v190_v56, 0.0 }
 0x10f   :  { %v818_v59 = vpop.f32.mrb[2].mxu0  ;;  %v223_v60 = vmax.f32 %v185_v58, 0.0 }
 0x110   :  { %v200_v62 = vadd.f32 %v818_v59, %v717_v54  ;;  %v194_v63 = vpop.f32.mrb[3].mxu0 }
 0x111   :  { %v195_v0 = vadd.f32 %v717_v54, %v194_v63  ;;  %857 = vmatprep.mubr.f32.mxu1 %v223_v60 }
 0x112   :  { %858 = vmatmul.mubr.f32.vlgmr.msra.gmra.mrb[0].mxu1 %v224_v61  ;;  %v226_v3 = vmax.f32 %v200_v62, 0.0 }
 0x113   :  { %v225_v1 = vmax.f32 %v195_v0, 0.0  ;;  %v821_v2 = vpop.f32.mrb[4].mxu0  ;;  %1061 = vmatpush3.bf16.msra.mxu1 %v1021_v21  ;;  %v517_v0 = vld [vmem:[#allocation6 + $0x70] sm:$0xff] }
 0x114   :  { %v210_v4 = vadd.f32 %v821_v2, %v717_v54  ;;  %v204_v5 = vpop.f32.mrb[5].mxu0  ;;  %1054 = vmatprep.subr.bf16.mxu1 %v1025_v23 }
 0x115   :  { %v205_v6 = vadd.f32 %v717_v54, %v204_v5  ;;  %860 = vmatprep.mubr.f32.mxu1 %v225_v1  ;;  %v518_v1 = vld [vmem:[#allocation6 + $0x78] sm:$0xff] }
 0x116   :  { %v228_v7 = vmax.f32 %v210_v4, 0.0  ;;  %861 = vmatmul.mubr.f32.gmra.mrb[2].mxu1 %v226_v3  ;;  %v1049_v2 = vpack.c.bf16 %v518_v1, %v517_v0  ;;  %v728_v3 = vld [vmem:[%s1360_s6] ss:$0 sm:$0xff] }
 0x117   :  { %v227_v8 = vmax.f32 %v205_v6, 0.0  ;;  %v824_v9 = vpop.f32.mrb[6].mxu0  ;;  %1062 = vmatpush3.bf16.msra.mxu1 %v1025_v23 }
 0x118   :  { %v220_v10 = vadd.f32 %v824_v9, %v717_v54  ;;  %v214_v11 = vpop.f32.mrb[7].mxu0  ;;  %1055 = vmatprep.subr.bf16.mxu1 %v1029_v26 }
 0x119   :  { %v215_v12 = vadd.f32 %v717_v54, %v214_v11  ;;  %863 = vmatprep.mubr.f32.mxu1 %v227_v8 }
 0x11a   :  { %v230_v13 = vmax.f32 %v220_v10, 0.0  ;;  %864 = vmatmul.mubr.f32.gmra.mrb[4].mxu1 %v228_v7 }
 0x11b   :  { %v229_v14 = vmax.f32 %v215_v12, 0.0  ;;  %1063 = vmatpush3.bf16.msra.mxu1 %v1029_v26 }
 0x11c   :  { %1056 = vmatprep.subr.bf16.mxu1 %v1033_v29 }
 0x11d   :  { %866 = vmatprep.mubr.f32.mxu1 %v229_v14 }
 0x11e   :  { %867 = vmatmul.mubr.f32.gmra.mrb[6].mxu1 %v230_v13 }
 0x11f   :  { %1064 = vmatpush3.bf16.msra.mxu1 %v1033_v29 }
 0x120   :  { %1057 = vmatprep.subr.bf16.mxu1 %v1037_v32 }
 0x123   :  { %1065 = vmatpush3.bf16.msra.mxu1 %v1037_v32 }
 0x124   :  { %1058 = vmatprep.subr.bf16.mxu1 %v1041_v35 }
 0x127   :  { %1066 = vmatpush3.bf16.msra.mxu1 %v1041_v35 }
 0x128   :  { %1059 = vmatprep.subr.bf16.mxu1 %v1045_v38 }
 0x12b   :  { %1067 = vmatpush3.bf16.msra.mxu1 %v1045_v38 }
 0x12c   :  { %1060 = vmatprep.subr.bf16.mxu1 %v1049_v2 }
 0x12f   :  { %1068 = vmatpush3.bf16.msra.mxu1 %v1049_v2 }
 0x1e5   :  { %v859_v40 = vpop.f32.mrb[0].mxu1 }
 0x1e6   :  { %v326_v41 = vadd.f32 %v859_v40, %v727_v39  ;;  %v320_v42 = vpop.f32.mrb[1].mxu1 }
 0x1e7   :  { %v321_v43 = vadd.f32 %v727_v39, %v320_v42 }
 0x1e8   :  { %v360_v46 = vmax.f32 %v326_v41, 0.0 }
 0x1e9   :  { %v359_v44 = vmax.f32 %v321_v43, 0.0  ;;  %v862_v45 = vpop.f32.mrb[2].mxu1 }
 0x1ea   :  { %v336_v47 = vadd.f32 %v862_v45, %v727_v39  ;;  %v330_v48 = vpop.f32.mrb[3].mxu1 }
 0x1eb   :  { %v331_v49 = vadd.f32 %v727_v39, %v330_v48  ;;  %901 = vmatprep.mubr.f32.mxu0 %v359_v44 }
 0x1ec   :  { %902 = vmatmul.mubr.f32.vlgmr.msra.gmra.mrb[8].mxu0 %v360_v46  ;;  %v362_v52 = vmax.f32 %v336_v47, 0.0 }
 0x1ed   :  { %v361_v50 = vmax.f32 %v331_v49, 0.0  ;;  %v865_v51 = vpop.f32.mrb[4].mxu1  ;;  %1024 = vmatpush3.bf16.msra.mxu0 %v1021_v21 }
 0x1ee   :  { %v346_v53 = vadd.f32 %v865_v51, %v727_v39  ;;  %v340_v54 = vpop.f32.mrb[5].mxu1  ;;  %1026 = vmatprep.subr.bf16.mxu0 %v1025_v23 }
 0x1ef   :  { %v341_v55 = vadd.f32 %v727_v39, %v340_v54  ;;  %904 = vmatprep.mubr.f32.mxu0 %v361_v50 }
 0x1f0   :  { %v364_v56 = vmax.f32 %v346_v53, 0.0  ;;  %905 = vmatmul.mubr.f32.gmra.mrb[10].mxu0 %v362_v52 }
 0x1f1   :  { %v363_v57 = vmax.f32 %v341_v55, 0.0  ;;  %v868_v58 = vpop.f32.mrb[6].mxu1  ;;  %1028 = vmatpush3.bf16.msra.mxu0 %v1025_v23 }
 0x1f2   :  { %v356_v59 = vadd.f32 %v868_v58, %v727_v39  ;;  %v350_v60 = vpop.f32.mrb[7].mxu1  ;;  %1030 = vmatprep.subr.bf16.mxu0 %v1029_v26 }
 0x1f3   :  { %v351_v61 = vadd.f32 %v727_v39, %v350_v60  ;;  %907 = vmatprep.mubr.f32.mxu0 %v363_v57 }
 0x1f4   :  { %v366_v62 = vmax.f32 %v356_v59, 0.0  ;;  %908 = vmatmul.mubr.f32.gmra.mrb[12].mxu0 %v364_v56 }
 0x1f5   :  { %v365_v63 = vmax.f32 %v351_v61, 0.0  ;;  %1032 = vmatpush3.bf16.msra.mxu0 %v1029_v26 }
 0x1f6   :  { %1034 = vmatprep.subr.bf16.mxu0 %v1033_v29 }
 0x1f7   :  { %910 = vmatprep.mubr.f32.mxu0 %v365_v63 }
 0x1f8   :  { %911 = vmatmul.mubr.f32.gmra.mrb[14].mxu0 %v366_v62 }
 0x1f9   :  { %1036 = vmatpush3.bf16.msra.mxu0 %v1033_v29 }
 0x1fa   :  { %1038 = vmatprep.subr.bf16.mxu0 %v1037_v32 }
 0x1fd   :  { %1040 = vmatpush3.bf16.msra.mxu0 %v1037_v32 }
 0x1fe   :  { %1042 = vmatprep.subr.bf16.mxu0 %v1041_v35 }
 0x201   :  { %1044 = vmatpush3.bf16.msra.mxu0 %v1041_v35 }
 0x202   :  { %1046 = vmatprep.subr.bf16.mxu0 %v1045_v38 }
 0x205   :  { %1048 = vmatpush3.bf16.msra.mxu0 %v1045_v38 }
 0x206   :  { %1050 = vmatprep.subr.bf16.mxu0 %v1049_v2 }
 0x209   :  { %1052 = vmatpush3.bf16.msra.mxu0 %v1049_v2 }
 0x2bf   :  { %v903_v4 = vpop.f32.mrb[8].mxu0 }
 0x2c0   :  { %v462_v5 = vadd.f32 %v903_v4, %v728_v3  ;;  %v456_v6 = vpop.f32.mrb[9].mxu0 }
 0x2c1   :  { %v457_v7 = vadd.f32 %v728_v3, %v456_v6 }
 0x2c2   :  { %v496_v10 = vmax.f32 %v462_v5, 0.0 }
 0x2c3   :  { %v495_v8 = vmax.f32 %v457_v7, 0.0  ;;  %v906_v9 = vpop.f32.mrb[10].mxu0 }
 0x2c4   :  { %v472_v11 = vadd.f32 %v906_v9, %v728_v3  ;;  %v466_v12 = vpop.f32.mrb[11].mxu0 }
 0x2c5   :  { %v467_v13 = vadd.f32 %v728_v3, %v466_v12  ;;  %945 = vmatprep.mubr.f32.mxu0 %v495_v8 }
 0x2c6   :  { %946 = vmatmul.mubr.f32.vlgmr.msra.gmra.mrb[16].mxu0 %v496_v10  ;;  %v498_v16 = vmax.f32 %v472_v11, 0.0 }
 0x2c7   :  { %v497_v14 = vmax.f32 %v467_v13, 0.0  ;;  %v909_v15 = vpop.f32.mrb[12].mxu0 }
 0x2c8   :  { %v482_v17 = vadd.f32 %v909_v15, %v728_v3  ;;  %v476_v18 = vpop.f32.mrb[13].mxu0 }
 0x2c9   :  { %v477_v19 = vadd.f32 %v728_v3, %v476_v18  ;;  %948 = vmatprep.mubr.f32.mxu1 %v497_v14 }
 0x2ca   :  { %949 = vmatmul.mubr.f32.vlgmr.msra.gmra.mrb[8].mxu1 %v498_v16  ;;  %v500_v22 = vmax.f32 %v482_v17, 0.0 }
 0x2cb   :  { %v499_v20 = vmax.f32 %v477_v19, 0.0  ;;  %v912_v21 = vpop.f32.mrb[14].mxu0 }
 0x2cc   :  { %v492_v23 = vadd.f32 %v912_v21, %v728_v3  ;;  %v486_v24 = vpop.f32.mrb[15].mxu0 }
 0x2cd   :  { %v487_v25 = vadd.f32 %v728_v3, %v486_v24  ;;  %951 = vmatprep.mubr.f32.mxu1 %v499_v20 }
 0x2ce   :  { %952 = vmatmul.mubr.f32.gmra.mrb[10].mxu1 %v500_v22  ;;  %v502_v27 = vmax.f32 %v492_v23, 0.0 }
 0x2cf   :  { %v501_v26 = vmax.f32 %v487_v25, 0.0 }
 0x2d1   :  { %954 = vmatprep.mubr.f32.mxu1 %v501_v26 }
 0x2d2   :  { %955 = vmatmul.mubr.f32.gmra.mrb[12].mxu1 %v502_v27 }
 0x399   :  { %v947_v29 = vpop.f32.mrb[16].mxu0 }
 0x39a   :  { %v598_v30 = vadd.f32 %v947_v29, %v729_v28  ;;  %v592_v31 = vpop.f32.mrb[17].mxu0 }
 0x39b   :  { %v593_v33 = vadd.f32 %v729_v28, %v592_v31 }
 0x39c   :  { %633 = vmax.xlane.f32.xlu0 %v598_v30 }
 0x39d   :  { %v950_v32 = vpop.f32.mrb[8].mxu1 }
 0x39e   :  { %v608_v34 = vadd.f32 %v950_v32, %v729_v28  ;;  %v602_v35 = vpop.f32.mrb[9].mxu1 }
 0x39f   :  { %v603_v37 = vadd.f32 %v729_v28, %v602_v35 }
 0x3a0   :  { %637 = vmax.xlane.f32.xlu1 %v608_v34  ;;  %631 = vmax.xlane.f32.xlu0 %v593_v33 }
 0x3a1   :  { %v953_v36 = vpop.f32.mrb[10].mxu1 }
 0x3a2   :  { %v612_v38 = vpop.f32.mrb[11].mxu1  ;;  %v618_v41 = vadd.f32 %v953_v36, %v729_v28 }
 0x3a3   :  { %v613_v39 = vadd.f32 %v729_v28, %v612_v38 }
 0x3a4   :  { %635 = vmax.xlane.f32.xlu1 %v603_v37 }
 0x3a5   :  { %v956_v40 = vpop.f32.mrb[12].mxu1  ;;  %639 = vmax.xlane.f32.xlu0 %v613_v39 }
 0x3a6   :  { %v622_v42 = vpop.f32.mrb[13].mxu1  ;;  %v628_v44 = vadd.f32 %v956_v40, %v729_v28 }
 0x3a7   :  { %v623_v43 = vadd.f32 %v729_v28, %v622_v42 }
 0x3a8   :  { %641 = vmax.xlane.f32.xlu1 %v618_v41 }
 0x3a9   :  { %643 = vmax.xlane.f32.xlu0 %v623_v43 }
 0x3ac   :  { %645 = vmax.xlane.f32.xlu1 %v628_v44 }
 0x429   :  { %v634_v45 = vpop.xlane.xlu0 %633 }
 0x42a   :  { %v648_v46 = vsub.f32 %v598_v30, %v634_v45 }
 0x42c   :  { %v657_v47 = vmul.f32 1.442695, %v648_v46 }
 0x42d   :  { %v638_v48 = vpop.xlane.xlu1 %637  ;;  %v632_v49 = vpop.xlane.xlu0 %631 }
 0x42e   :  { %1074 = vpow2.f32 %v657_v47  ;;  %v650_v50 = vsub.f32 %v608_v34, %v638_v48  ;;  %v647_v51 = vsub.f32 %v593_v33, %v632_v49 }
 0x430   :  { %v661_v52 = vmul.f32 1.442695, %v650_v50  ;;  %v655_v53 = vmul.f32 1.442695, %v647_v51 }
 0x431   :  { %v636_v54 = vpop.xlane.xlu1 %635 }
 0x432   :  { %1076 = vpow2.f32 %v661_v52  ;;  %v649_v55 = vsub.f32 %v603_v37, %v636_v54  ;;  %v640_v56 = vpop.xlane.xlu0 %639 }
 0x433   :  { %1078 = vpow2.f32 %v655_v53  ;;  %v651_v57 = vsub.f32 %v613_v39, %v640_v56 }
 0x434   :  { %v659_v58 = vmul.f32 1.442695, %v649_v55 }
 0x435   :  { %v642_v59 = vpop.xlane.xlu1 %641  ;;  %v663_v62 = vmul.f32 1.442695, %v651_v57 }
 0x436   :  { %1080 = vpow2.f32 %v659_v58  ;;  %v652_v60 = vsub.f32 %v618_v41, %v642_v59  ;;  %v644_v61 = vpop.xlane.xlu0 %643 }
 0x437   :  { %v653_v63 = vsub.f32 %v623_v43, %v644_v61 }
 0x438   :  { %v1075_v0 = vpop.eup %1074  ;;  %v665_v1 = vmul.f32 1.442695, %v652_v60 }
 0x439   :  { %v646_v2 = vpop.xlane.xlu1 %645  ;;  %673 = vadd.xlane.f32.xlu1 %v1075_v0  ;;  %v667_v4 = vmul.f32 1.442695, %v653_v63 }
 0x43a   :  { %1082 = vpow2.f32 %v665_v1  ;;  %v654_v3 = vsub.f32 %v628_v44, %v646_v2 }
 0x43b   :  { %1084 = vpow2.f32 %v663_v62 }
 0x43c   :  { %v1077_v5 = vpop.eup %1076  ;;  %v669_v6 = vmul.f32 1.442695, %v654_v3 }
 0x43d   :  { %v1079_v7 = vpop.eup %1078  ;;  %677 = vadd.xlane.f32.xlu1 %v1077_v5 }
 0x43e   :  { %1086 = vpow2.f32 %v669_v6  ;;  %671 = vadd.xlane.f32.xlu0 %v1079_v7 }
 0x43f   :  { %1088 = vpow2.f32 %v667_v4 }
 0x440   :  { %v1081_v8 = vpop.eup %1080 }
 0x442   :  { %675 = vadd.xlane.f32.xlu0 %v1081_v8 }
 0x444   :  { %v1083_v9 = vpop.eup %1082 }
 0x445   :  { %v1085_v10 = vpop.eup %1084  ;;  %681 = vadd.xlane.f32.xlu1 %v1083_v9 }
 0x446   :  { %679 = vadd.xlane.f32.xlu0 %v1085_v10 }
 0x448   :  { %v1087_v11 = vpop.eup %1086 }
 0x449   :  { %v1089_v12 = vpop.eup %1088  ;;  %685 = vadd.xlane.f32.xlu1 %v1087_v11 }
 0x44a   :  { %683 = vadd.xlane.f32.xlu0 %v1089_v12 }
 0x4c6   :  { %v674_v13 = vpop.xlane.xlu1 %673 }
 0x4c7   :  { %1090 = vrcp.f32 %v674_v13 }
 0x4ca   :  { %v678_v14 = vpop.xlane.xlu1 %677 }
 0x4cb   :  { %1092 = vrcp.f32 %v678_v14  ;;  %v672_v15 = vpop.xlane.xlu0 %671 }
 0x4cc   :  { %1094 = vrcp.f32 %v672_v15 }
 0x4cf   :  { %v676_v16 = vpop.xlane.xlu0 %675 }
 0x4d0   :  { %1096 = vrcp.f32 %v676_v16 }
 0x4d1   :  { %v1091_v17 = vpop.eup %1090 }
 0x4d2   :  { %v690_v18 = vmul.f32 %v1091_v17, %v1075_v0  ;;  %v682_v19 = vpop.xlane.xlu1 %681 }
 0x4d3   :  { %1098 = vrcp.f32 %v682_v19  ;;  %v680_v20 = vpop.xlane.xlu0 %679 }
 0x4d4   :  { %704 = vst [vmem:[%s1363_s9 + $0x8] sm:$0xff] %v690_v18  ;;  %1100 = vrcp.f32 %v680_v20 }
 0x4d5   :  { %v1093_v21 = vpop.eup %1092 }
 0x4d6   :  { %v1095_v22 = vpop.eup %1094  ;;  %v694_v23 = vmul.f32 %v1093_v21, %v1077_v5  ;;  %v686_v24 = vpop.xlane.xlu1 %685 }
 0x4d7   :  { %v688_v25 = vmul.f32 %v1095_v22, %v1079_v7  ;;  %1102 = vrcp.f32 %v686_v24  ;;  %v684_v26 = vpop.xlane.xlu0 %683 }
 0x4d8   :  { %706 = vst [vmem:[%s1363_s9 + $0x18] sm:$0xff] %v694_v23  ;;  %1104 = vrcp.f32 %v684_v26 }
 0x4d9   :  { %703 = vst [vmem:[%s1363_s9] sm:$0xff] %v688_v25 }
 0x4da   :  { %v1097_v27 = vpop.eup %1096 }
 0x4db   :  { %v692_v28 = vmul.f32 %v1097_v27, %v1081_v8 }
 0x4dd   :  { %v1099_v29 = vpop.eup %1098  ;;  %705 = vst [vmem:[%s1363_s9 + $0x10] sm:$0xff] %v692_v28 }
 0x4de   :  { %v1101_v30 = vpop.eup %1100  ;;  %v698_v31 = vmul.f32 %v1099_v29, %v1083_v9 }
 0x4df   :  { %v696_v32 = vmul.f32 %v1101_v30, %v1085_v10 }
 0x4e0   :  { %708 = vst [vmem:[%s1363_s9 + $0x28] sm:$0xff] %v698_v31 }
 0x4e1   :  { %v1103_v33 = vpop.eup %1102  ;;  %707 = vst [vmem:[%s1363_s9 + $0x20] sm:$0xff] %v696_v32 }
 0x4e2   :  { %v1105_v34 = vpop.eup %1104  ;;  %v702_v35 = vmul.f32 %v1103_v33, %v1087_v11 }
 0x4e3   :  { %v700_v36 = vmul.f32 %v1105_v34, %v1089_v12 }
 0x4e4   :  { %710 = vst [vmem:[%s1363_s9 + $0x38] sm:$0xff] %v702_v35 }
 0x4e5   :  { %709 = vst [vmem:[%s1363_s9 + $0x30] sm:$0xff] %v700_v36 }
 0x4e6   :  { %715 = vsyncpa [#allocation3], 1 }
 0x4e7   :  { %716 = vsyncpa [#allocation5], 1 }

</bundles_post_ra>
